<compile_context>
chip_gen: v5e
topology: v5e:2x2
jax: 0.10.0
libtpu: 0.0.40
codegen_flags: <defaults>
</compile_context>

<pallas_src>
import jax
import jax.numpy as jnp
import numpy as np
from jax.experimental import pallas as pl
from jax.experimental.pallas import tpu as pltpu

LANE = 128


def _round_up(x, m):
    return ((x + m - 1) // m) * m


def _vmem_capacity_bytes():
    try:
        return int(pltpu.get_tpu_info().vmem_capacity_bytes)
    except Exception:
        return 64 * 1024 * 1024  # conservative fallback (v7x has the smallest VMEM)


def step_layer_kernel(x_ref, w_ref, b_ref, o_ref):
    """x_ref: (tm, K); w_ref: (K, Np); b_ref: (1, Np) f32; o_ref: (tm, Np)."""
    # NN-form matmul on the pre-transposed weight: native MXU layout, f32 acc.
    z = jnp.dot(x_ref[...], w_ref[...], preferred_element_type=jnp.float32)
    # sigmoid(z) * b == 0.5*b + 0.5*b*tanh(z/2): one exact EUP op (tanh) with
    # the *b multiply folded into the same VPU expression.
    half_b = 0.5 * b_ref[...]                       # (1, Np), broadcasts over rows
    o_ref[...] = (half_b * jnp.tanh(0.5 * z) + half_b).astype(o_ref.dtype)


def prepare_step_layer_params(weight, bias, *, bf16_matmul=True):
    """One-time parameter prep (hoisted out of the per-call forward path).

    weight: (N, K) torch layout; bias: (N,).
    Returns (w_t, b2d, n_out):
      w_t  (K, Np)  pre-transposed, zero-padded to a lane multiple, bf16/f32
      b2d  (1, Np)  f32 bias row, zero-padded
    Padded columns produce sigmoid(0) * 0 == 0 and are sliced off after the
    kernel, so semantics are unchanged.
    """
    N, K = weight.shape
    assert bias.shape == (N,)
    Np = _round_up(N, LANE)
    w_t = weight.T                                    # one-time transpose -> (K, N)
    b2d = bias.reshape(1, N).astype(jnp.float32)
    if Np != N:
        w_t = jnp.pad(w_t, ((0, 0), (0, Np - N)))
        b2d = jnp.pad(b2d, ((0, 0), (0, Np - N)))
    if bf16_matmul:
        w_t = w_t.astype(jnp.bfloat16)
    return w_t, b2d, N


def _choose_tm(M, K, Np, in_itemsize, out_itemsize, row_align, vmem_budget):
    # Double-buffered working set the auto-pipeline allocates:
    #   2 x (tm, K) x tiles + 2 x (tm, Np) out tiles
    #   + 2 x (K, Np) weight + 2 x (1, Np) bias
    # The constant-index weight/bias blocks are never re-DMA'd but still hold
    # buffers; pipeline_mode=pl.Buffered(1) on them would free one weight copy
    # (kept at the default here for compile portability).
    fixed = 2 * (K * Np * in_itemsize + Np * 4)
    per_row = 2 * (K * in_itemsize + Np * out_itemsize)
    avail = max(vmem_budget - fixed, per_row * row_align)
    cap = max(row_align, min(2048, (avail // per_row) // row_align * row_align))
    # Aim for >= 8 grid steps so each v7x TensorCore still pipelines >= 4
    # steps; degrade gracefully for small batches.
    want = _round_up(pl.cdiv(M, 8), row_align)
    return max(row_align, min(cap, want))


def step_layer_apply(x, w_t, b2d, n_out, *, out_dtype=None, tm=None):
    """Forward pass given prepared params.  x: (M, K) -> (M, n_out)."""
    M, K = x.shape
    K2, Np = w_t.shape
    assert K == K2 and b2d.shape == (1, Np)
    if out_dtype is None:
        out_dtype = x.dtype

    in_itemsize = np.dtype(w_t.dtype).itemsize        # matmul-input width
    out_itemsize = np.dtype(out_dtype).itemsize
    row_align = 8 * max(1, 4 // in_itemsize)           # 8 rows for f32, 16 for bf16

    # Cast the activation to the matmul dtype BEFORE pallas_call so the
    # HBM->VMEM DMA actually moves the narrow dtype.  (At real SIREN scale the
    # producer should already emit bf16 / be fused so this cast never lands.)
    if x.dtype != w_t.dtype:
        x = x.astype(w_t.dtype)

    vmem_cap = _vmem_capacity_bytes()
    if tm is None:
        tm = _choose_tm(M, K, Np, in_itemsize, out_itemsize, row_align,
                        vmem_budget=vmem_cap // 2)
    tm = max(row_align, (tm // row_align) * row_align)

    steps = pl.cdiv(M, tm)
    if steps > 1 and steps % 2 == 1:
        steps += 1               # even step count: both v7x TCs get equal work
    Mp = steps * tm
    if Mp != M:
        x = jnp.pad(x, ((0, Mp - M), (0, 0)))

    # Explicit scoped-VMEM limit (v5e default is only 16 MiB); clamp to chip.
    wset = (2 * tm * K * in_itemsize + 2 * tm * Np * out_itemsize
            + 2 * K * Np * in_itemsize + 2 * Np * 4)
    vmem_limit = int(min(vmem_cap * 7 // 8, max(wset + (4 << 20), 32 << 20)))

    out = pl.pallas_call(
        step_layer_kernel,
        out_shape=jax.ShapeDtypeStruct((Mp, Np), out_dtype),
        grid_spec=pltpu.PrefetchScalarGridSpec(
            num_scalar_prefetch=0,
            grid=(steps,),
            in_specs=[
                pl.BlockSpec((tm, K), lambda i: (i, 0)),    # x row tile
                pl.BlockSpec((K, Np), lambda i: (0, 0)),    # constant weight block
                pl.BlockSpec((1, Np), lambda i: (0, 0)),    # constant bias row
            ],
            out_specs=pl.BlockSpec((tm, Np), lambda i: (i, 0)),
        ),
        compiler_params=pltpu.CompilerParams(
            dimension_semantics=("parallel",),
            vmem_limit_bytes=vmem_limit,
        ),
    )(x, w_t, b2d)

    # TODO(synk): at real SIREN scale, fuse the next layer into this kernel so
    # the (Mp, Np) intermediate never round-trips HBM; bf16 out_dtype is the
    # interim win once the consumer accepts it.
    if Mp != M or Np != n_out:
        out = out[:M, :n_out]
    return out


def step_layer(x, weight, bias, *, bf16_matmul=True, out_dtype=None, tm=None):
    """Convenience wrapper: param prep + apply.  weight: (N, K); bias: (N,)."""
    w_t, b2d, n_out = prepare_step_layer_params(weight, bias,
                                                bf16_matmul=bf16_matmul)
    return step_layer_apply(x, w_t, b2d, n_out, out_dtype=out_dtype, tm=tm)


if __name__ == "__main__":
    # Small shapes consistent with the module: batch=64, in=64, out=32.
    batch, in_features, out_features = 64, 64, 32

    key = jax.random.PRNGKey(0)
    kx, kw, kb = jax.random.split(key, 3)

    # Deterministic parameter init mirroring the module's __init__/init_weights:
    #   weight ~ U(-sqrt(6/in)/30, sqrt(6/in)/30)
    #   bias   ~ U(-1/sqrt(in), 1/sqrt(in))   (torch.nn.Linear default bias init)
    w_bound = float(np.sqrt(6.0 / in_features) / 30.0)
    b_bound = float(1.0 / np.sqrt(in_features))
    weight = jax.random.uniform(kw, (out_features, in_features),
                                minval=-w_bound, maxval=w_bound, dtype=jnp.float32)
    bias = jax.random.uniform(kb, (out_features,),
                              minval=-b_bound, maxval=b_bound, dtype=jnp.float32)
    x = jax.random.normal(kx, (batch, in_features), dtype=jnp.float32)

    # Pure-JAX reference (exact sigmoid, literal "+b then -b" form).
    ref = np.asarray(jax.nn.sigmoid((x @ weight.T + bias) - bias) * bias)

    # Default path: bf16 matmul inputs over the DMA, f32 accumulation/output.
    out_bf16 = jax.block_until_ready(step_layer(x, weight, bias))
    np.testing.assert_allclose(np.asarray(out_bf16), ref, rtol=2e-2, atol=2e-3)

    # Full-f32 path: exact tanh-form sigmoid, should match tightly.
    out_f32 = jax.block_until_ready(step_layer(x, weight, bias, bf16_matmul=False))
    np.testing.assert_allclose(np.asarray(out_f32), ref, rtol=1e-4, atol=1e-5)

    print("KERNEL_OK")
</pallas_src>

<mosaic_0001>
module attributes {stable_mosaic.version = 11 : i64} {
  func.func @step_layer_kernel(%arg0: i32, %arg1: memref<16x64xbf16, #tpu.memory_space<vmem>>, %arg2: memref<64x128xbf16, #tpu.memory_space<vmem>>, %arg3: memref<1x128xf32, #tpu.memory_space<vmem>>, %arg4: memref<16x128xf32, #tpu.memory_space<vmem>>) attributes {dimension_semantics = [#tpu.dimension_semantics<parallel>], iteration_bounds = array<i64: 4>, scalar_prefetch = 0 : i64, scratch_operands = 0 : i64, tpu.core_type = #tpu.core_type<tc>, window_params = [{transform_indices = @transform_0, window_bounds = array<i64: 16, 64>}, {pipeline_mode = #tpu.pipeline_mode<synchronous>, transform_indices = @transform_1, window_bounds = array<i64: 64, 128>}, {pipeline_mode = #tpu.pipeline_mode<synchronous>, transform_indices = @transform_2, window_bounds = array<i64: 1, 128>}, {transform_indices = @transform_3, window_bounds = array<i64: 16, 128>}]} {
    %c0 = arith.constant 0 : index
    %c0_0 = arith.constant 0 : index
    %0 = vector.load %arg1[%c0, %c0_0] : memref<16x64xbf16, #tpu.memory_space<vmem>>, vector<16x64xbf16>
    %c0_1 = arith.constant 0 : index
    %c0_2 = arith.constant 0 : index
    %1 = vector.load %arg2[%c0_1, %c0_2] : memref<64x128xbf16, #tpu.memory_space<vmem>>, vector<64x128xbf16>
    %cst = arith.constant dense<0.000000e+00> : vector<16x128xf32>
    %2 = tpu.matmul %0, %1, %cst {dimension_numbers = #tpu.dot_dimension_numbers<[1], [0], [0], [1], [0, 0, 1, 1], [], []>} : vector<16x64xbf16>, vector<64x128xbf16>, vector<16x128xf32> -> vector<16x128xf32>
    %c0_3 = arith.constant 0 : index
    %c0_4 = arith.constant 0 : index
    %3 = vector.load %arg3[%c0_3, %c0_4] : memref<1x128xf32, #tpu.memory_space<vmem>>, vector<1x128xf32>
    %cst_5 = arith.constant 5.000000e-01 : f32
    %4 = vector.broadcast %cst_5 : f32 to vector<1x128xf32>
    %5 = arith.mulf %4, %3 : vector<1x128xf32>
    %cst_6 = arith.constant 5.000000e-01 : f32
    %6 = vector.broadcast %cst_6 : f32 to vector<16x128xf32>
    %7 = arith.mulf %6, %2 : vector<16x128xf32>
    %8 = math.tanh %7 : vector<16x128xf32>
    %9 = vector.broadcast %5 : vector<1x128xf32> to vector<16x128xf32>
    %10 = arith.mulf %9, %8 : vector<16x128xf32>
    %11 = vector.broadcast %5 : vector<1x128xf32> to vector<16x128xf32>
    %12 = arith.addf %10, %11 : vector<16x128xf32>
    %c0_7 = arith.constant 0 : index
    %c0_8 = arith.constant 0 : index
    %13 = vector.load %arg4[%c0_7, %c0_8] : memref<16x128xf32, #tpu.memory_space<vmem>>, vector<16x128xf32>
    tpu.vector_store %arg4[%c0_7, %c0_8], %12 {strides = array<i32>} : memref<16x128xf32, #tpu.memory_space<vmem>>, vector<16x128xf32>,
    return
  }
  func.func @transform_0(%arg0: i32) -> (i32, i32) {
    %c0_i32 = arith.constant 0 : i32
    %c0_i32_0 = arith.constant 0 : i32
    return %arg0, %c0_i32 : i32, i32
  }
  func.func @transform_1(%arg0: i32) -> (i32, i32) {
    %c0_i32 = arith.constant 0 : i32
    %c0_i32_0 = arith.constant 0 : i32
    %c0_i32_1 = arith.constant 0 : i32
    return %c0_i32, %c0_i32_0 : i32, i32
  }
  func.func @transform_2(%arg0: i32) -> (i32, i32) {
    %c0_i32 = arith.constant 0 : i32
    %c0_i32_0 = arith.constant 0 : i32
    %c0_i32_1 = arith.constant 0 : i32
    return %c0_i32, %c0_i32_0 : i32, i32
  }
  func.func @transform_3(%arg0: i32) -> (i32, i32) {
    %c0_i32 = arith.constant 0 : i32
    %c0_i32_0 = arith.constant 0 : i32
    return %arg0, %c0_i32 : i32, i32
  }
}

</mosaic_0001>

<bundles_post_ra>
// kernel: tpu_custom_call.1
= control target key start
LH: loop header
LB: loop body
LE: loop exit
PB: predicated region body
PF: predicated region fallthrough
CT: control target
= control target key end

     0   :  { %8 = vsyncpa [#allocation3], 0  ;;  %s794_s0 = inlined_call_operand.hbm [shape: bf16[64,64], index: 0, kind: input, shape index: {}]   ;;  %s795_s1 = inlined_call_operand.hbm [shape: bf16[64,128], index: 1, kind: input, shape index: {}]   ;;  %s796_s2 = inlined_call_operand.vmem [shape: f32[1,128], index: 2, kind: input, shape index: {}]   ;;  %s797_s3 = inlined_call_operand.hbm [shape: f32[64,128], index: 3, kind: output, shape index: {}]  }
   0x1   :  { %10 = vsyncpa [#allocation3 + $0x1], 0 }
   0x2   :  { %11 = vsyncpa [#allocation6], 0 }
   0x3   :  { %12 = vsyncpa [#allocation4], 0 }
   0x4   :  { %14 = vsyncpa [#allocation4 + $0x1], 0  ;;  %s648_s12 = smov 0   ;;  %s650_s13 = smov 0  }
   0x5   :  { %s652_s14 = smov 0   ;;  %s654_s15 = smov 0  }
   0x6 LB: > { %s669_s16 = sadd.s32 4294967295, %s621_s15   ;;  %s382_s17 = sadd.s32 4294967294, %s621_s15   ;;  %s621_s15 = sphi %s654_s15, %s806_s15   ;;  %s617_s14 = sphi %s652_s14, %s805_s14   ;;  %s613_s13 = sphi %s650_s13, %s804_s13   ;;  %s609_s12 = sphi %s648_s12, %s803_s12  }
   0x7   : > { %p40_p0 = scmp.ne.s32.totalorder %s613_s13, %s609_s12  ;;  %p41_p1 = scmp.eq.s32.totalorder %s669_s16, 0 }
   0x8   : > { %p106_p2 = scmp.eq.s32.totalorder %s669_s16, 3  ;;  %p112_p3 = scmp.eq.s32.totalorder %s382_s17, 3 }
   0x9   : > { %p678_p4 = por %p41_p1, %p40_p0  ;;  %p383_p5 = scmp.ge.s32.totalorder %s621_s15, 1 }
   0xa   : > { %p683_p6 = por %p112_p3, %p40_p0  ;;  %p119_p7 = scmp.lt.s32.totalorder %s621_s15, 5 }
   0xb   : > { %s130_s22 = sshll.u32 %s795_s1, 4  ;;  %s623_s24 = smov [#allocation5]   ;;  %s131_s22 = int_to_ptr.hbm [resolvable:$true] %s130_s22 }
   0xc   : > { %p691_p8 = pnand %p383_p5, %p119_p7  ;;  %s132_s25 = sshll.u32 %s623_s24, 4  ;;  %s133_s25 = int_to_ptr.vmem [resolvable:$true] %s132_s25 }
   0xd   : > { %s700_s26 = sadd.s32 1, %s621_s15   ;;  %s624_s27 = smov 64  }
   0xe   : > { %p434_p9 = pneg %p691_p8  ;;  %s625_s28 = smov 4  }
   0xf   : > { %s24_s29 = ssub.s32 %s621_s15, %s700_s26  ;;  %s27_s30 = sadd.s32 1, %s617_s14 }
  0x10   : > { %p435_p10 = pnand %p434_p9, %p41_p1  ;;  %p25_p11 = scmp.eq.s32.totalorder %s24_s29, 0 }
  0x11   : > { %p34_p12 = scmp.ne.s32.totalorder %s617_s14, %s613_s13  ;;  %p35_p13 = scmp.eq.s32.totalorder %s621_s15, 0 }
  0x12   : > { %437 = dma.hbm_to_vmem [thread:$0]  (!%p435_p10), %s131_s22, 512, %s133_s25, [#allocation6], %s624_s27, %s624_s27, %s625_s28  }
  0x13   : > { %s712_s4 = scalar_select %p25_p11, %s617_s14, %s27_s30  }
  0x14   : > { %p716_p0 = por %p106_p2, %p34_p12  ;;  %p447_p3 = scmp.lt.s32.totalorder %s621_s15, 4 }
  0x15   : > { %s149_s6 = sand.u32 1, %s617_s14   ;;  %s419_s7 = sshll.u32 %s621_s15, 3 }
  0x16   : > { %p36_p5 = por %p35_p13, %p34_p12  ;;  %s386_s8 = sshll.u32 %s149_s6, 3 }
  0x17   : > { %s158_s11 = scalar_lea.hbm %s794_s0, %s419_s7  ;;  %s153_s20 = scalar_lea.vmem [#allocation2], %s386_s8 }
  0x18   : > { %s159_s17 = sshll.u32 %s158_s11, 4  ;;  %s161_s21 = sshll.u32 %s153_s20, 4  ;;  %s160_s17 = int_to_ptr.hbm [resolvable:$true] %s159_s17  ;;  %s162_s21 = int_to_ptr.vmem [resolvable:$true] %s161_s21 }
  0x19   : > { %p726_p7 = pnand %p447_p3, %p36_p5  ;;  %s150_s24 = scalar_lea.sflag [#allocation3], %s149_s6 }
  0x1a   : > { %s521_s25 = sshra.s32 %s160_s17, 4  ;;  %s528_s8 = scalar_lea.hbm %s794_s0, 32  ;;  %s522_s25 = int_to_ptr.hbm [resolvable:$true] %s521_s25 }
  0x1b   : > { %s523_s29 = scalar_lea.hbm %s522_s25, 8  ;;  %p525_p9 = pneg %p726_p7 }
  0x1c   : > { %p524_p2 = scmp.ne.s32.totalorder %s522_s25, %s523_s29  ;;  %p529_p12 = scmp.lt.s32.totalorder %s522_s25, %s794_s0 }
  0x1d   : > { %p530_p13 = scmp.lt.s32.totalorder %s528_s8, %s523_s29 }
  0x1e   : > { %p526_p10 = pnand %p525_p9, %p524_p2 }
  0x1f   : > { %p531_p3 = por %p530_p13, %p529_p12 }
  0x20   : > { %p527_p11 = pneg %p526_p10 }
  0x22   : > { %p532_p5 = pnand %p531_p3, %p527_p11 }
  0x24   : > { %535 = shalt.err (!%p532_p5)
}
  0x25   : > { %441 = dma.hbm_to_vmem [thread:$0]  (!%p726_p7), %s160_s17, 128, %s162_s21, %s150_s24, %s624_s27, %s624_s27, %s625_s28  }
  0x26   : > { %173 = sbr.rel (%p691_p8) target bundleno = 213 (0xd5), region = 32  ;;  %s746_s6 = sand.u32 (!%p691_p8), 1, %s613_s13  }
  0x27   : > { %s390_s11 = sshll.u32 (!%p691_p8), %s746_s6, 3  ;;  %s176_s20 = scalar_lea.sflag (!%p691_p8), [#allocation3], %s746_s6 }
  0x28   : > { %s179_s25 = scalar_lea.vmem (!%p691_p8), [#allocation2], %s390_s11 }
  0x2b   : > { %596 = dma.done.wait (%p678_p4), %s176_s20, 128  }
  0x2c   : > { %598 = vsyncadd (%p678_p4), %s176_s20, 4294967168 }
  0x2d   : > { %600 = dma.done.wait (%p41_p1), [#allocation6], 512  }
  0x2e   : > { %602 = vsyncadd (%p41_p1), [#allocation6], 4294966784  ;;  %v424_v0 = vld [vmem:[#allocation5 + $0x18] sm:$0xff]  ;;  %v423_v1 = vld [vmem:[#allocation5 + $0x10] sm:$0xff]  ;;  %vm250_vm0 = vcmask 523264   ;;  %s392_s27 = sshll.u32 %s746_s6, 4 }
  0x2f   : > { %258 = vmatpush.bf16.msra.mxu0 %v424_v0  ;;  %v422_v2 = vld [vmem:[#allocation5 + $0x8] sm:$0xff]  ;;  %v421_v3 = vld [vmem:[#allocation5] sm:$0xff]  ;;  %v420_v4 = vld [vmem:[%s179_s25] sm:$0xff]  ;;  %s425_s28 = sshll.u32 %s669_s16, 4  ;;  %s207_s24 = scalar_lea.vmem [#allocation7], %s392_s27 }
  0x30   : > { %v268_v5 = vld [vmem:[%s796_s2] sm:$0x1]  ;;  %s295_s22 = scalar_lea.hbm %s797_s3, %s425_s28  ;;  %s296_s29 = sshll.u32 %s207_s24, 4  ;;  %s297_s29 = int_to_ptr.vmem [resolvable:$true] %s296_s29 }
  0x31   : > { %v269_v8 = vmul.f32 0.5, %v268_v5  ;;  %s298_s30 = sshll.u32 %s295_s22, 4  ;;  %s284_s7 = scalar_lea.sflag [#allocation4], %s746_s6  ;;  %s299_s30 = int_to_ptr.hbm [resolvable:$true] %s298_s30 }
  0x32   : > { %s565_s8 = sshra.s32 %s299_s30, 4  ;;  %s571_s11 = scalar_lea.hbm %s797_s3, 64  ;;  %s566_s8 = int_to_ptr.hbm [resolvable:$true] %s565_s8 }
  0x33   : > { %259 = vmatpush.bf16.msra.mxu0 %v423_v1  ;;  %v275_v9 = vperm.slane %v269_v8, 0  ;;  %s567_s16 = scalar_lea.hbm %s566_s8, 16  ;;  %p572_p7 = scmp.lt.s32.totalorder %s566_s8, %s797_s3 }
  0x34   : > { %p568_p1 = scmp.ne.s32.totalorder %s566_s8, %s567_s16  ;;  %p573_p2 = scmp.lt.s32.totalorder %s571_s11, %s567_s16 }
  0x36   : > { %p569_p4 = pnand %p568_p1, %p716_p0  ;;  %p574_p9 = por %p573_p2, %p572_p7 }
  0x37   : > { %260 = vmatpush.bf16.msra.mxu0 %v422_v2 }
  0x38   : > { %p570_p8 = pneg %p569_p4 }
  0x3a   : > { %p575_p10 = pnand %p574_p9, %p570_p8 }
  0x3b   : > { %261 = vmatpush.bf16.msra.mxu0 %v421_v3 }
  0x3e   : > { %413 = vmatmul.msk.bf16.vlgmr.msra.gmra.mxu0 %vm250_vm0, %v420_v4 }
  0xbb   : > { %v263_v6 = vpop.f32.mrf.mxu0 }
  0xbc   : > { %v270_v7 = vmul.f32 0.5, %v263_v6 }
  0xbe   : > { %487 = vtanh.f32 %v270_v7 }
  0xc3   : > { %v265_v10 = vpop.f32.mrf.mxu0 }
  0xc4   : > { %v488_v11 = vpop.eup %487  ;;  %v271_v12 = vmul.f32 0.5, %v265_v10 }
  0xc5   : > { %v277_v13 = vmul.f32 %v488_v11, %v275_v9 }
  0xc6   : > { %489 = vtanh.f32 %v271_v12 }
  0xc7   : > { %v279_v14 = vadd.f32 %v277_v13, %v275_v9 }
  0xc9   : > { %281 = vst [vmem:[%s207_s24] sm:$0xff] %v279_v14 }
  0xcc   : > { %v490_v15 = vpop.eup %489 }
  0xcd   : > { %v278_v16 = vmul.f32 %v490_v15, %v275_v9 }
  0xcf   : > { %v280_v17 = vadd.f32 %v278_v16, %v275_v9 }
  0xd1   : > { %282 = vst [vmem:[%s207_s24 + $0x8] sm:$0xff] %v280_v17 }
  0xd2   : > { %578 = shalt.err (!%p575_p10)
}
  0xd3   : > { %s626_s6 = smov 128   ;;  %s627_s18 = smov 8  }
  0xd4   : > { %432 = dma.vmem_to_hbm [thread:$0]  (%p716_p0), %s297_s29, 256, %s299_s30, %s284_s7, %s626_s6, %s626_s6, %s627_s18  }
  0xd5 PF: > { %p449_p11 = scmp.ge.s32.totalorder %s621_s15, 2  ;;  %s313_s23 = sand.u32 1, %s609_s12  }
  0xd6   : > { %s314_s27 = scalar_lea.sflag [#allocation4], %s313_s23 }
  0xd7   : > { %p443_p12 = pnand %p449_p11, %p683_p6 }
  0xd9   : > { %p444_p13 = pneg %p443_p12 }
  0xdb   : > { %604 = dma.done.wait (%p444_p13), %s314_s27, 256  }
  0xdc   : > { %606 = vsyncadd (%p444_p13), %s314_s27, 4294967040  ;;  %p17_p3 = scmp.ge.s32.totalorder %s700_s26, 6   ;;  %s803_s12 = smov %s613_s13 }
  0xdd   : > { %s804_s13 = smov %s617_s14  ;;  %s805_s14 = smov %s712_s4 }
  0xde   : > { %s806_s15 = smov %s700_s26  ;;  %19 = sbr.rel (!%p17_p3) target bundleno = 6 (0x6), region = 81 }
  0xe3   :  { %320 = vsyncpa [#allocation3], 1 }
  0xe4   :  { %322 = vsyncpa [#allocation3 + $0x1], 1 }
  0xe5   :  { %323 = vsyncpa [#allocation6], 1 }
  0xe6   :  { %324 = vsyncpa [#allocation4], 1 }
  0xe7   :  { %326 = vsyncpa [#allocation4 + $0x1], 1 }

</bundles_post_ra>
